<compile_context>
chip_gen: v7x
topology: tpu7x:2x2x1
jax: 0.10.0
libtpu: 0.0.40
codegen_flags: <defaults>
</compile_context>

<pallas_src>
import functools

import jax
import jax.numpy as jnp
from jax.experimental import pallas as pl
from jax.experimental.pallas import tpu as pltpu

_MiB = 1024 * 1024


def _inconv_kernel(x_ref, w_ref, b_ref, gamma_ref, beta_ref, alpha_ref,
                   o_ref, *scratch, resident, inv_n, eps):
    # x_ref:     (1, Cin, T)    input tile, H*W on the lane axis
    # w_ref:     (Cout, Cin)    1x1 conv weight
    # b_ref:     (Cout, 1)      conv bias
    # gamma_ref: (Cout, 1)      GroupNorm weight
    # beta_ref:  (Cout, 1)      GroupNorm bias
    # alpha_ref: (1,)           PReLU slope (SMEM, scalar path)
    # o_ref:     (1, Cout, T)   output tile (lane-dense stores)
    # scratch (resident):   y_ref (nt, Cout, T), psum, pssq (Cout, T),
    #                       scale, shift (Cout, 1)
    # scratch (recompute):  psum, pssq, scale, shift
    if resident:
        y_ref, psum_ref, pssq_ref, scale_ref, shift_ref = scratch
    else:
        psum_ref, pssq_ref, scale_ref, shift_ref = scratch

    p = pl.program_id(1)   # phase: 0 = conv + stats, 1 = normalize + store
    t = pl.program_id(2)   # HW tile index

    def compute_y():
        # 1x1 conv == channel matmul: (Cout, Cin) @ (Cin, T) -> (Cout, T)
        y = jnp.dot(w_ref[...], x_ref[0], preferred_element_type=jnp.float32)
        return y + b_ref[...]                       # (Cout, 1) broadcast

    @pl.when(jnp.logical_and(p == 0, t == 0))
    def _():
        psum_ref[...] = jnp.zeros_like(psum_ref)
        pssq_ref[...] = jnp.zeros_like(pssq_ref)

    @pl.when(p == 0)
    def _():
        y = compute_y()
        if resident:
            y_ref[t] = y                            # keep conv output in VMEM
        # Elementwise partial accumulation (VPU adds only; the single
        # XLU reduction happens once per sample at (p==1, t==0)).
        psum_ref[...] += y
        pssq_ref[...] += y * y

    @pl.when(jnp.logical_and(p == 1, t == 0))
    def _():
        s = jnp.sum(psum_ref[...], keepdims=True)       # (1, 1)
        ssq = jnp.sum(pssq_ref[...], keepdims=True)     # (1, 1)
        mean = s * inv_n
        var = jnp.maximum(ssq * inv_n - mean * mean, 0.0)   # clamp cancellation
        inv = jax.lax.rsqrt(var + eps)
        scale = gamma_ref[...] * inv                    # (Cout, 1)
        scale_ref[...] = scale
        shift_ref[...] = beta_ref[...] - mean * scale   # (Cout, 1)

    @pl.when(p == 1)
    def _():
        y = y_ref[t] if resident else compute_y()
        z = y * scale_ref[...] + shift_ref[...]         # one FMA per element
        a = alpha_ref[0]                                # scalar PReLU slope
        o_ref[0] = jnp.where(z >= 0, z, a * z).astype(o_ref.dtype)


def _vmem_capacity_bytes():
    """Best-effort VMEM capacity query; conservative (v7x = 64 MiB) fallback."""
    try:
        info = pltpu.get_tpu_info()
        for attr in ("vmem_capacity_bytes", "vmem_size_bytes", "vmem_bytes"):
            cap = getattr(info, attr, None)
            if cap:
                return int(cap)
    except Exception:
        pass
    return 64 * _MiB


def _pick_tile_hw(hw, per_lane_bytes, budget_bytes):
    """Largest power-of-two multiple of 128 dividing HW whose per-step
    pipeline working set stays under budget_bytes."""
    if hw % 128 != 0:
        return hw                      # block == full dim is always legal
    t = 128
    while (2 * t <= hw and hw % (2 * t) == 0
           and per_lane_bytes * 2 * t <= budget_bytes):
        t *= 2
    return t


def inconv_forward(x_nchw, w, b, gamma, beta, alpha, *,
                   tile_hw=None, y_resident=None):
    """x_nchw: (N, Cin, H, W); w: (Cout, Cin); b/gamma/beta: (Cout,); alpha scalar."""
    N, Cin, H, W = x_nchw.shape
    Cout = w.shape[0]
    HW = H * W

    # --- VMEM budgets (generation-aware; v7x has only 64 MiB per TC). ------
    vmem_cap = _vmem_capacity_bytes()
    vmem_limit = min(int(vmem_cap * 3 // 4), 100 * _MiB)   # ~48 MiB v7x, ~96 MiB v5e/v6e

    # f32 bytes per HW lane in the per-step working set:
    #   x (double-buffered) + out (double-buffered) + psum/pssq scratch.
    per_lane = 4 * (2 * Cin + 2 * Cout + 2 * Cout)
    tile_budget = min(16 * _MiB, vmem_limit // 3)
    if tile_hw is None:
        tile_hw = _pick_tile_hw(HW, per_lane, tile_budget)
    assert HW % tile_hw == 0
    nt = HW // tile_hw

    # y-resident fast path: keep the whole per-sample conv output in VMEM so
    # phase 1 never re-reads x or re-runs the matmul.
    y_bytes = 4 * Cout * HW
    if y_resident is None:
        y_resident = (y_bytes + per_lane * tile_hw + 4 * _MiB) <= vmem_limit

    x_nc = x_nchw.reshape(N, Cin, HW)                    # free reshape
    w32 = w.astype(jnp.float32)
    b2 = b.reshape(Cout, 1).astype(jnp.float32)
    g2 = gamma.reshape(Cout, 1).astype(jnp.float32)
    be2 = beta.reshape(Cout, 1).astype(jnp.float32)
    a1 = jnp.asarray(alpha, jnp.float32).reshape(1)

    kernel = functools.partial(
        _inconv_kernel, resident=y_resident,
        inv_n=1.0 / float(Cout * HW), eps=1e-8)

    # x index map: walk tiles in phase 0; in the resident path pin phase 1 to
    # the last phase-0 tile so the pipeliner issues no x DMA at all in phase 1.
    if y_resident:
        last = nt - 1
        x_map = lambda n, p, t: (n, 0, t * (1 - p) + last * p)
    else:
        x_map = lambda n, p, t: (n, 0, t)

    scratch = []
    if y_resident:
        scratch.append(pltpu.VMEM((nt, Cout, tile_hw), jnp.float32))  # y
    scratch += [pltpu.VMEM((Cout, tile_hw), jnp.float32),             # psum
                pltpu.VMEM((Cout, tile_hw), jnp.float32),             # pssq
                pltpu.VMEM((Cout, 1), jnp.float32),                   # scale
                pltpu.VMEM((Cout, 1), jnp.float32)]                   # shift

    out_nc = pl.pallas_call(
        kernel,
        out_shape=jax.ShapeDtypeStruct((N, Cout, HW), x_nchw.dtype),
        grid_spec=pltpu.PrefetchScalarGridSpec(
            num_scalar_prefetch=0,
            grid=(N, 2, nt),                             # (sample, phase, HW tile)
            in_specs=[
                pl.BlockSpec((1, Cin, tile_hw), x_map),
                pl.BlockSpec((Cout, Cin), lambda n, p, t: (0, 0)),
                pl.BlockSpec((Cout, 1), lambda n, p, t: (0, 0)),
                pl.BlockSpec((Cout, 1), lambda n, p, t: (0, 0)),
                pl.BlockSpec((Cout, 1), lambda n, p, t: (0, 0)),
                pl.BlockSpec(memory_space=pltpu.MemorySpace.SMEM),   # alpha
            ],
            # Phase 0 pins the output block index to tile 0, so nothing is
            # written back during the stats pass; phase 1 walks the tiles and
            # produces exactly one lane-dense store per output tile.
            out_specs=pl.BlockSpec((1, Cout, tile_hw),
                                   lambda n, p, t: (n, 0, t * p)),
            scratch_shapes=scratch,
        ),
        compiler_params=pltpu.CompilerParams(
            dimension_semantics=("parallel", "arbitrary", "arbitrary"),
            vmem_limit_bytes=vmem_limit,
        ),
    )(x_nc, w32, b2, g2, be2, a1)

    return out_nc.reshape(N, Cout, H, W)                 # free reshape to NCHW


def _reference(x_nchw, w, b, gamma, beta, alpha):
    # Pure-JAX reference (matches the PyTorch module semantics).
    N, Cin, H, W = x_nchw.shape
    Cout = w.shape[0]
    x = x_nchw.reshape(N, Cin, H * W)
    y = jnp.einsum("oc,ncp->nop", w, x) + b[None, :, None]
    mean = jnp.mean(y, axis=(1, 2), keepdims=True)
    var = jnp.mean((y - mean) ** 2, axis=(1, 2), keepdims=True)
    z = (y - mean) / jnp.sqrt(var + 1e-8)
    z = z * gamma[None, :, None] + beta[None, :, None]
    out = jnp.where(z >= 0, z, alpha * z)
    return out.reshape(N, Cout, H, W)


if __name__ == "__main__":
    key = jax.random.PRNGKey(0)
    k_x, k_w, k_b, k_g, k_be = jax.random.split(key, 5)

    N, Cin, Cout, H, W = 2, 4, 8, 16, 16

    x = jax.random.normal(k_x, (N, Cin, H, W), dtype=jnp.float32)
    w = jax.random.normal(k_w, (Cout, Cin), dtype=jnp.float32) * 0.1   # 1x1 conv weight
    b = jax.random.normal(k_b, (Cout,), dtype=jnp.float32) * 0.1       # conv bias
    gamma = jnp.ones((Cout,), jnp.float32) + 0.01 * jax.random.normal(k_g, (Cout,))
    beta = 0.01 * jax.random.normal(k_be, (Cout,), dtype=jnp.float32)
    alpha = jnp.float32(0.25)                                          # PReLU default init

    ref = _reference(x, w, b, gamma, beta, alpha)

    # Default path: auto tile, y-resident fast path (fits easily at this size).
    out = jax.block_until_ready(inconv_forward(x, w, b, gamma, beta, alpha))
    assert out.shape == (N, Cout, H, W)
    assert jnp.allclose(out, ref, atol=1e-5, rtol=1e-5)

    # Force the multi-tile recompute fallback (HW=256 -> two 128-wide tiles,
    # no y scratch) so both code paths are exercised.
    out_recompute = jax.block_until_ready(
        inconv_forward(x, w, b, gamma, beta, alpha, tile_hw=128, y_resident=False))
    assert jnp.allclose(out_recompute, ref, atol=1e-5, rtol=1e-5)

    # Force the resident path with multiple tiles (y scratch indexed by tile).
    out_res_tiled = jax.block_until_ready(
        inconv_forward(x, w, b, gamma, beta, alpha, tile_hw=128, y_resident=True))
    assert jnp.allclose(out_res_tiled, ref, atol=1e-5, rtol=1e-5)

    print("KERNEL_OK")
</pallas_src>

<mosaic_0001>
module attributes {stable_mosaic.version = 11 : i64} {
  func.func @_inconv_kernel(%arg0: i32, %arg1: i32, %arg2: i32, %arg3: memref<1x4x256xf32, #tpu.memory_space<vmem>>, %arg4: memref<8x4xf32, #tpu.memory_space<vmem>>, %arg5: memref<8x1xf32, #tpu.memory_space<vmem>>, %arg6: memref<8x1xf32, #tpu.memory_space<vmem>>, %arg7: memref<8x1xf32, #tpu.memory_space<vmem>>, %arg8: memref<1xf32, #tpu.memory_space<smem>>, %arg9: memref<1x8x256xf32, #tpu.memory_space<vmem>>, %arg10: memref<1x8x256xf32, #tpu.memory_space<vmem>>, %arg11: memref<8x256xf32, #tpu.memory_space<vmem>>, %arg12: memref<8x256xf32, #tpu.memory_space<vmem>>, %arg13: memref<8x1xf32, #tpu.memory_space<vmem>>, %arg14: memref<8x1xf32, #tpu.memory_space<vmem>>) attributes {dimension_semantics = [#tpu.dimension_semantics<parallel>, #tpu.dimension_semantics<arbitrary>, #tpu.dimension_semantics<arbitrary>], iteration_bounds = array<i64: 2, 2, 1>, scalar_prefetch = 0 : i64, scratch_operands = 5 : i64, tpu.core_type = #tpu.core_type<tc>, window_params = [{transform_indices = @transform_0, window_bounds = array<i64: 1, 4, 256>}, {pipeline_mode = #tpu.pipeline_mode<synchronous>, transform_indices = @transform_1, window_bounds = array<i64: 8, 4>}, {pipeline_mode = #tpu.pipeline_mode<synchronous>, transform_indices = @transform_2, window_bounds = array<i64: 8, 1>}, {pipeline_mode = #tpu.pipeline_mode<synchronous>, transform_indices = @transform_3, window_bounds = array<i64: 8, 1>}, {pipeline_mode = #tpu.pipeline_mode<synchronous>, transform_indices = @transform_4, window_bounds = array<i64: 8, 1>}, {transform_indices = @transform_5, window_bounds = array<i64: 1>}, {transform_indices = @transform_6, window_bounds = array<i64: 1, 8, 256>}]} {
    %c0_i32 = arith.constant 0 : i32
    %0 = arith.cmpi eq, %arg1, %c0_i32 : i32
    %c0_i32_0 = arith.constant 0 : i32
    %1 = arith.cmpi eq, %arg2, %c0_i32_0 : i32
    %2 = arith.andi %0, %1 : i1
    %3 = arith.extui %2 : i1 to i32
    %c0_i32_1 = arith.constant 0 : i32
    %4 = arith.cmpi ne, %3, %c0_i32_1 : i32
    scf.if %4 {
      %cst = arith.constant 0.000000e+00 : f32
      %16 = vector.broadcast %cst : f32 to vector<8x256xf32>
      %c0 = arith.constant 0 : index
      %c0_8 = arith.constant 0 : index
      %17 = vector.load %arg11[%c0, %c0_8] : memref<8x256xf32, #tpu.memory_space<vmem>>, vector<8x256xf32>
      tpu.vector_store %arg11[%c0, %c0_8], %16 {strides = array<i32>} : memref<8x256xf32, #tpu.memory_space<vmem>>, vector<8x256xf32>,
      %cst_9 = arith.constant 0.000000e+00 : f32
      %18 = vector.broadcast %cst_9 : f32 to vector<8x256xf32>
      %c0_10 = arith.constant 0 : index
      %c0_11 = arith.constant 0 : index
      %19 = vector.load %arg12[%c0_10, %c0_11] : memref<8x256xf32, #tpu.memory_space<vmem>>, vector<8x256xf32>
      tpu.vector_store %arg12[%c0_10, %c0_11], %18 {strides = array<i32>} : memref<8x256xf32, #tpu.memory_space<vmem>>, vector<8x256xf32>,
    } else {
    }
    %c0_i32_2 = arith.constant 0 : i32
    %5 = arith.cmpi eq, %arg1, %c0_i32_2 : i32
    %6 = arith.extui %5 : i1 to i32
    %c0_i32_3 = arith.constant 0 : i32
    %7 = arith.cmpi ne, %6, %c0_i32_3 : i32
    scf.if %7 {
      %c0 = arith.constant 0 : index
      %c0_8 = arith.constant 0 : index
      %16 = vector.load %arg4[%c0, %c0_8] : memref<8x4xf32, #tpu.memory_space<vmem>>, vector<8x4xf32>
      %c0_9 = arith.constant 0 : index
      %c0_10 = arith.constant 0 : index
      %c0_11 = arith.constant 0 : index
      %17 = vector.load %arg3[%c0_9, %c0_10, %c0_11] : memref<1x4x256xf32, #tpu.memory_space<vmem>>, vector<1x4x256xf32>
      %18 = vector.shape_cast %17 : vector<1x4x256xf32> to vector<4x256xf32>
      %cst = arith.constant dense<0.000000e+00> : vector<8x256xf32>
      %19 = tpu.matmul %16, %18, %cst {dimension_numbers = #tpu.dot_dimension_numbers<[1], [0], [0], [1], [0, 0, 1, 1], [], []>} : vector<8x4xf32>, vector<4x256xf32>, vector<8x256xf32> -> vector<8x256xf32>
      %c0_12 = arith.constant 0 : index
      %c0_13 = arith.constant 0 : index
      %20 = vector.load %arg5[%c0_12, %c0_13] : memref<8x1xf32, #tpu.memory_space<vmem>>, vector<8x1xf32>
      %21 = vector.broadcast %20 : vector<8x1xf32> to vector<8x256xf32>
      %22 = arith.addf %19, %21 : vector<8x256xf32>
      %23 = arith.index_cast %arg2 : i32 to index
      %c0_14 = arith.constant 0 : index
      %c0_15 = arith.constant 0 : index
      %24 = vector.load %arg10[%23, %c0_14, %c0_15] : memref<1x8x256xf32, #tpu.memory_space<vmem>>, vector<1x8x256xf32>
      %25 = vector.shape_cast %24 : vector<1x8x256xf32> to vector<8x256xf32>
      %26 = vector.shape_cast %22 : vector<8x256xf32> to vector<1x8x256xf32>
      tpu.vector_store %arg10[%23, %c0_14, %c0_15], %26 {strides = array<i32>} : memref<1x8x256xf32, #tpu.memory_space<vmem>>, vector<1x8x256xf32>,
      %c0_16 = arith.constant 0 : index
      %c0_17 = arith.constant 0 : index
      %27 = vector.load %arg11[%c0_16, %c0_17] : memref<8x256xf32, #tpu.memory_space<vmem>>, vector<8x256xf32>
      %28 = arith.addf %27, %22 : vector<8x256xf32>
      %c0_18 = arith.constant 0 : index
      %c0_19 = arith.constant 0 : index
      %29 = vector.load %arg11[%c0_18, %c0_19] : memref<8x256xf32, #tpu.memory_space<vmem>>, vector<8x256xf32>
      tpu.vector_store %arg11[%c0_18, %c0_19], %28 {strides = array<i32>} : memref<8x256xf32, #tpu.memory_space<vmem>>, vector<8x256xf32>,
      %c0_20 = arith.constant 0 : index
      %c0_21 = arith.constant 0 : index
      %30 = vector.load %arg12[%c0_20, %c0_21] : memref<8x256xf32, #tpu.memory_space<vmem>>, vector<8x256xf32>
      %31 = arith.mulf %22, %22 : vector<8x256xf32>
      %32 = arith.addf %30, %31 : vector<8x256xf32>
      %c0_22 = arith.constant 0 : index
      %c0_23 = arith.constant 0 : index
      %33 = vector.load %arg12[%c0_22, %c0_23] : memref<8x256xf32, #tpu.memory_space<vmem>>, vector<8x256xf32>
      tpu.vector_store %arg12[%c0_22, %c0_23], %32 {strides = array<i32>} : memref<8x256xf32, #tpu.memory_space<vmem>>, vector<8x256xf32>,
    } else {
    }
    %c1_i32 = arith.constant 1 : i32
    %8 = arith.cmpi eq, %arg1, %c1_i32 : i32
    %c0_i32_4 = arith.constant 0 : i32
    %9 = arith.cmpi eq, %arg2, %c0_i32_4 : i32
    %10 = arith.andi %8, %9 : i1
    %11 = arith.extui %10 : i1 to i32
    %c0_i32_5 = arith.constant 0 : i32
    %12 = arith.cmpi ne, %11, %c0_i32_5 : i32
    scf.if %12 {
      %c0 = arith.constant 0 : index
      %c0_8 = arith.constant 0 : index
      %16 = vector.load %arg11[%c0, %c0_8] : memref<8x256xf32, #tpu.memory_space<vmem>>, vector<8x256xf32>
      %17 = vector.shape_cast %16 : vector<8x256xf32> to vector<1x8x256xf32>
      %cst = arith.constant dense<0.000000e+00> : vector<1xf32>
      %18 = vector.multi_reduction <add>, %17, %cst [1, 2] : vector<1x8x256xf32> to vector<1xf32>
      %19 = vector.shape_cast %18 : vector<1xf32> to vector<1x1x1xf32>
      %20 = vector.extract %19[0, 0, 0] : f32 from vector<1x1x1xf32>
      %21 = vector.broadcast %20 : f32 to vector<1x1xf32>
      %c0_9 = arith.constant 0 : index
      %c0_10 = arith.constant 0 : index
      %22 = vector.load %arg12[%c0_9, %c0_10] : memref<8x256xf32, #tpu.memory_space<vmem>>, vector<8x256xf32>
      %23 = vector.shape_cast %22 : vector<8x256xf32> to vector<1x8x256xf32>
      %cst_11 = arith.constant dense<0.000000e+00> : vector<1xf32>
      %24 = vector.multi_reduction <add>, %23, %cst_11 [1, 2] : vector<1x8x256xf32> to vector<1xf32>
      %25 = vector.shape_cast %24 : vector<1xf32> to vector<1x1x1xf32>
      %26 = vector.extract %25[0, 0, 0] : f32 from vector<1x1x1xf32>
      %27 = vector.broadcast %26 : f32 to vector<1x1xf32>
      %cst_12 = arith.constant 4.8828125E-4 : f32
      %28 = vector.broadcast %cst_12 : f32 to vector<1x1xf32>
      %29 = arith.mulf %21, %28 : vector<1x1xf32>
      %cst_13 = arith.constant 4.8828125E-4 : f32
      %30 = vector.broadcast %cst_13 : f32 to vector<1x1xf32>
      %31 = arith.mulf %27, %30 : vector<1x1xf32>
      %32 = arith.mulf %29, %29 : vector<1x1xf32>
      %33 = arith.subf %31, %32 : vector<1x1xf32>
      %cst_14 = arith.constant 0.000000e+00 : f32
      %34 = vector.broadcast %cst_14 : f32 to vector<1x1xf32>
      %35 = arith.maximumf %33, %34 : vector<1x1xf32>
      %cst_15 = arith.constant 9.99999993E-9 : f32
      %36 = vector.broadcast %cst_15 : f32 to vector<1x1xf32>
      %37 = arith.addf %35, %36 : vector<1x1xf32>
      %38 = math.rsqrt %37 : vector<1x1xf32>
      %c0_16 = arith.constant 0 : index
      %c0_17 = arith.constant 0 : index
      %39 = vector.load %arg6[%c0_16, %c0_17] : memref<8x1xf32, #tpu.memory_space<vmem>>, vector<8x1xf32>
      %40 = vector.broadcast %38 : vector<1x1xf32> to vector<8x1xf32>
      %41 = arith.mulf %39, %40 : vector<8x1xf32>
      %c0_18 = arith.constant 0 : index
      %c0_19 = arith.constant 0 : index
      %42 = vector.load %arg13[%c0_18, %c0_19] : memref<8x1xf32, #tpu.memory_space<vmem>>, vector<8x1xf32>
      tpu.vector_store %arg13[%c0_18, %c0_19], %41 {strides = array<i32>} : memref<8x1xf32, #tpu.memory_space<vmem>>, vector<8x1xf32>,
      %c0_20 = arith.constant 0 : index
      %c0_21 = arith.constant 0 : index
      %43 = vector.load %arg7[%c0_20, %c0_21] : memref<8x1xf32, #tpu.memory_space<vmem>>, vector<8x1xf32>
      %44 = vector.broadcast %29 : vector<1x1xf32> to vector<8x1xf32>
      %45 = arith.mulf %44, %41 : vector<8x1xf32>
      %46 = arith.subf %43, %45 : vector<8x1xf32>
      %c0_22 = arith.constant 0 : index
      %c0_23 = arith.constant 0 : index
      %47 = vector.load %arg14[%c0_22, %c0_23] : memref<8x1xf32, #tpu.memory_space<vmem>>, vector<8x1xf32>
      tpu.vector_store %arg14[%c0_22, %c0_23], %46 {strides = array<i32>} : memref<8x1xf32, #tpu.memory_space<vmem>>, vector<8x1xf32>,
    } else {
    }
    %c1_i32_6 = arith.constant 1 : i32
    %13 = arith.cmpi eq, %arg1, %c1_i32_6 : i32
    %14 = arith.extui %13 : i1 to i32
    %c0_i32_7 = arith.constant 0 : i32
    %15 = arith.cmpi ne, %14, %c0_i32_7 : i32
    scf.if %15 {
      %16 = arith.index_cast %arg2 : i32 to index
      %c0 = arith.constant 0 : index
      %c0_8 = arith.constant 0 : index
      %17 = vector.load %arg10[%16, %c0, %c0_8] : memref<1x8x256xf32, #tpu.memory_space<vmem>>, vector<1x8x256xf32>
      %18 = vector.shape_cast %17 : vector<1x8x256xf32> to vector<8x256xf32>
      %c0_9 = arith.constant 0 : index
      %c0_10 = arith.constant 0 : index
      %19 = vector.load %arg13[%c0_9, %c0_10] : memref<8x1xf32, #tpu.memory_space<vmem>>, vector<8x1xf32>
      %20 = vector.broadcast %19 : vector<8x1xf32> to vector<8x256xf32>
      %21 = arith.mulf %18, %20 : vector<8x256xf32>
      %c0_11 = arith.constant 0 : index
      %c0_12 = arith.constant 0 : index
      %22 = vector.load %arg14[%c0_11, %c0_12] : memref<8x1xf32, #tpu.memory_space<vmem>>, vector<8x1xf32>
      %23 = vector.broadcast %22 : vector<8x1xf32> to vector<8x256xf32>
      %24 = arith.addf %21, %23 : vector<8x256xf32>
      %c0_13 = arith.constant 0 : index
      %25 = memref.load %arg8[%c0_13] : memref<1xf32, #tpu.memory_space<smem>>
      %cst = arith.constant 0.000000e+00 : f32
      %26 = vector.broadcast %cst : f32 to vector<8x256xf32>
      %27 = arith.cmpf oge, %24, %26 : vector<8x256xf32>
      %28 = vector.broadcast %25 : f32 to vector<8x256xf32>
      %29 = arith.mulf %28, %24 : vector<8x256xf32>
      %30 = arith.select %27, %24, %29 : vector<8x256xi1>, vector<8x256xf32>
      %c0_14 = arith.constant 0 : index
      %c0_15 = arith.constant 0 : index
      %c0_16 = arith.constant 0 : index
      %31 = vector.load %arg9[%c0_14, %c0_15, %c0_16] : memref<1x8x256xf32, #tpu.memory_space<vmem>>, vector<1x8x256xf32>
      %32 = vector.shape_cast %31 : vector<1x8x256xf32> to vector<8x256xf32>
      %33 = vector.shape_cast %30 : vector<8x256xf32> to vector<1x8x256xf32>
      tpu.vector_store %arg9[%c0_14, %c0_15, %c0_16], %33 {strides = array<i32>} : memref<1x8x256xf32, #tpu.memory_space<vmem>>, vector<1x8x256xf32>,
    } else {
    }
    return
  }
  func.func @transform_0(%arg0: i32, %arg1: i32, %arg2: i32) -> (i32, i32, i32) {
    %c1_i32 = arith.constant 1 : i32
    %0 = arith.subi %c1_i32, %arg1 : i32
    %1 = arith.muli %arg2, %0 : i32
    %c0_i32 = arith.constant 0 : i32
    %2 = arith.muli %c0_i32, %arg1 : i32
    %3 = arith.addi %1, %2 : i32
    %c0_i32_0 = arith.constant 0 : i32
    %c0_i32_1 = arith.constant 0 : i32
    return %arg0, %c0_i32_0, %3 : i32, i32, i32
  }
  func.func @transform_1(%arg0: i32, %arg1: i32, %arg2: i32) -> (i32, i32) {
    %c0_i32 = arith.constant 0 : i32
    %c0_i32_0 = arith.constant 0 : i32
    %c0_i32_1 = arith.constant 0 : i32
    return %c0_i32, %c0_i32_0 : i32, i32
  }
  func.func @transform_2(%arg0: i32, %arg1: i32, %arg2: i32) -> (i32, i32) {
    %c0_i32 = arith.constant 0 : i32
    %c0_i32_0 = arith.constant 0 : i32
    %c0_i32_1 = arith.constant 0 : i32
    return %c0_i32, %c0_i32_0 : i32, i32
  }
  func.func @transform_3(%arg0: i32, %arg1: i32, %arg2: i32) -> (i32, i32) {
    %c0_i32 = arith.constant 0 : i32
    %c0_i32_0 = arith.constant 0 : i32
    %c0_i32_1 = arith.constant 0 : i32
    return %c0_i32, %c0_i32_0 : i32, i32
  }
  func.func @transform_4(%arg0: i32, %arg1: i32, %arg2: i32) -> (i32, i32) {
    %c0_i32 = arith.constant 0 : i32
    %c0_i32_0 = arith.constant 0 : i32
    %c0_i32_1 = arith.constant 0 : i32
    return %c0_i32, %c0_i32_0 : i32, i32
  }
  func.func @transform_5(%arg0: i32, %arg1: i32, %arg2: i32) -> i32 {
    %c0_i32 = arith.constant 0 : i32
    %c0_i32_0 = arith.constant 0 : i32
    return %c0_i32 : i32
  }
  func.func @transform_6(%arg0: i32, %arg1: i32, %arg2: i32) -> (i32, i32, i32) {
    %0 = arith.muli %arg2, %arg1 : i32
    %c0_i32 = arith.constant 0 : i32
    %c0_i32_0 = arith.constant 0 : i32
    return %arg0, %c0_i32, %0 : i32, i32, i32
  }
}

</mosaic_0001>

<bundles_post_ra>
// kernel: tpu_custom_call.1
= control target key start
LH: loop header
LB: loop body
LE: loop exit
PB: predicated region body
PF: predicated region fallthrough
CT: control target
= control target key end

     0   :  { %s1010_s0 = inlined_call_operand.vmem [shape: f32[2,4,256], index: 0, kind: input, shape index: {}]   ;;  %s1011_s1 = inlined_call_operand.vmem [shape: f32[8,4], index: 1, kind: input, shape index: {}]   ;;  %s1012_s2 = inlined_call_operand.vmem [shape: f32[8,1], index: 2, kind: input, shape index: {}]   ;;  %s1013_s3 = inlined_call_operand.vmem [shape: f32[8,1], index: 3, kind: input, shape index: {}]   ;;  %s1014_s4 = inlined_call_operand.vmem [shape: f32[8,1], index: 4, kind: input, shape index: {}]   ;;  %s1015_s5 = inlined_call_operand.<no memory space> [shape: f32[1], index: 5, kind: input, shape index: {}]   ;;  %s1016_s6 = inlined_call_operand.hbm [shape: f32[2,8,256], index: 6, kind: output, shape index: {}]  }
   0x1   :  { %11 = sst [smem:[#allocation7]] %s1015_s5 }
   0x2   :  { %12 = vsyncpa [#allocation9], 0 }
   0x3   :  { %14 = vsyncpa [#allocation9 + $0x1], 0  ;;  %s859_s23 = smov 0   ;;  %s861_s24 = smov 0  }
   0x4   :  { %s863_s25 = smov 0   ;;  %s865_s26 = smov 0  }
   0x5   :  { %s867_s27 = smov 0   ;;  %s869_s28 = smov 0  }
   0x6   :  { %s871_s29 = smov 0   ;;  %s873_s30 = smov 0  }
   0x7 LB: > { %s612_s5 = sadd.s32 4294967295, %s814_s30   ;;  %s613_s7 = sadd.s32 4294967294, %s814_s30   ;;  %s814_s30 = sphi %s873_s30, %s20_s30   ;;  %s810_s29 = sphi %s871_s29, %s1025_s29   ;;  %s806_s28 = sphi %s869_s28, %s1024_s28   ;;  %s802_s27 = sphi %s867_s27, %s1023_s27   ;;  %s798_s26 = sphi %s865_s26, %s1022_s26   ;;  %s794_s25 = sphi %s863_s25, %s1021_s25   ;;  %s790_s24 = sphi %s861_s24, %s1020_s24   ;;  %s786_s23 = sphi %s859_s23, %s1019_s23  }
   0x8   : > { %s35_s8 = sadd.s32 1, %s806_s28  ;;  %s39_s9 = sadd.s32 1, %s810_s29 }
   0x9   : > { %p37_p0 = scmp.ge.s32.totalorder %s35_s8, 2  ;;  %p197_p1 = scmp.ne.s32.totalorder %s794_s25, %s790_s24 }
   0xa   : > { %p198_p2 = scmp.eq.s32.totalorder %s612_s5, 3  ;;  %p203_p4 = scmp.ne.s32.totalorder %s790_s24, %s786_s23 }
   0xb   : > { %s1027_s8 = smov (%p37_p0, %s35_s8), 0  ;;  %s1029_s9 = smov (!%p37_p0, %s39_s9), %s810_s29 }
   0xc   : > { %p908_p3 = por %p198_p2, %p197_p1  ;;  %p41_p5 = scmp.ge.s32.totalorder %s1029_s9, 2 }
   0xd   : > { %p204_p6 = scmp.eq.s32.totalorder %s613_s7, 3  ;;  %p616_p7 = scmp.ge.s32.totalorder %s814_s30, 1 }
   0xe   : > { %p254_p8 = scmp.lt.s32.totalorder %s814_s30, 5  ;;  %s1031_s9 = smov (%p41_p5, %s1029_s9), 0 }
   0xf   : > { %p918_p9 = por %p204_p6, %p203_p4  ;;  %s182_s12 = ssub.s32 %s810_s29, %s1031_s9 }
  0x10   : > { %p255_p10 = pnand %p616_p7, %p254_p8  ;;  %s187_s13 = sadd.s32 1, %s794_s25 }
  0x11   : > { %p185_p11 = scmp.eq.s32.totalorder %s182_s12, 0  ;;  %s287_s15 = sand.u32 (!%p255_p10), 1, %s790_s24  }
  0x12   : > { %258 = sbr.rel (%p255_p10) target bundleno = 666 (0x29a), region = 44  ;;  %p293_p12 = scmp.lt.s32.totalorder (!%p255_p10), %s802_s27, 1 }
  0x13   : > { %s926_s14 = scalar_select %p185_p11, %s794_s25, %s187_s13  }
  0x14   : > { %s617_s16 = sshll.u32 (!%p255_p10), %s287_s15, 4  ;;  %p306_p13 = scmp.eq.s32.totalorder (!%p255_p10), %s798_s26, 0 }
  0x15   : > { %s937_s22 = scalar_lea.vmem (!%p255_p10), [#allocation8], %s617_s16 }
  0x19   : > { %s294_s17 = scalar_select %p293_p12, %s802_s27, 1 }
  0x1a   : > { %311 = sbr.rel (!%p306_p13) target bundleno = 33 (0x21), region = 48  ;;  %v816_v0 = vmov (%p306_p13), 0.0  }
  0x1b   : > { %s632_s18 = sshll.u32 %s294_s17, 3  ;;  %312 = vst [vmem:[#allocation3] sm:$0xff] (%p306_p13), %v816_v0  ;;  %313 = vst [vmem:[#allocation3 + $0x8] sm:$0xff] (%p306_p13), %v816_v0 }
  0x1c   : > { %s300_s21 = scalar_lea.vmem %s1010_s0, %s632_s18  ;;  %314 = vst [vmem:[#allocation4] sm:$0xff] (%p306_p13), %v816_v0  ;;  %315 = vst [vmem:[#allocation4 + $0x8] sm:$0xff] (%p306_p13), %v816_v0 }
  0x21 PF: > { %p621_p0 = scmp.ne.s32.totalorder %s798_s26, 0 }
  0x22   : > { %v320_v1 = vld [vmem:[%s300_s21] sm:$0xff] (!%p621_p0)  ;;  %vm333_vm0 = vcmask (!%p621_p0), 1043456   ;;  %v817_v3 = vmov (!%p621_p0), 0.0   ;;  %v818_v4 = vmov (!%p621_p0), 0   ;;  %vm329_vm1 = vcmask (!%p621_p0), 31744   ;;  %v414_v9 = vld [vmem:[#allocation3] sm:$0xff] (!%p621_p0) }
  0x23   : > { %318 = sbr.rel (%p621_p0) target bundleno = 259 (0x103), region = 52  ;;  %v328_v2 = vcombine.high (!%p621_p0), %v320_v1, %v320_v1  ;;  %402 = vmatprep.mubr.f32.mxu0 (!%p621_p0), %v817_v3  ;;  %715 = vset.pattern.permute.xlu0 (!%p621_p0), %v818_v4  ;;  %v321_v5 = vld [vmem:[%s1012_s2] sm:$0xff] (!%p621_p0)  ;;  %v415_v12 = vld [vmem:[#allocation3 + $0x8] sm:$0xff] (!%p621_p0)  ;;  %v421_v17 = vld [vmem:[#allocation4 + $0x8] sm:$0xff] (!%p621_p0) }
  0x24   : > { %v319_v6 = vld [vmem:[%s1011_s1] sm:$0xff] (!%p621_p0)  ;;  %324 = vperm.xlu0 (!%p621_p0), %715, %v321_v5  }
  0x25   : > { %622 = vmatprep.subr.msk.mxu0 (!%p621_p0), %vm333_vm0, %v328_v2  ;;  %v420_v13 = vld [vmem:[#allocation4] sm:$0xff] (!%p621_p0) }
  0x26   : > { %623 = vmatpush1.msk.msra.mxu0 (!%p621_p0), %vm333_vm0, %v320_v1 }
  0x27   : > { %624 = vmatmul.mubr.msk.f32.vlgmr.msra.gmra.mrb[0].mxu0 (!%p621_p0), %vm329_vm1, %v319_v6 }
  0xa3   : > { %v325_v7 = vpop.permute.xlu0 %324 }
  0xfa   : > { %v404_v8 = vpop.f32.mrb[0].mxu0 }
  0xfb   : > { %v405_v10 = vadd.f32 %v404_v8, %v325_v7  ;;  %v406_v11 = vpop.f32.mrb[1].mxu0 }
  0xfc   : > { %v407_v14 = vadd.f32 %v406_v11, %v325_v7 }
  0xfd   : > { %412 = vst [vmem:[#allocation2] sm:$0xff] %v405_v10  ;;  %v416_v15 = vadd.f32 %v414_v9, %v405_v10  ;;  %v422_v16 = vmul.f32 %v405_v10, %v405_v10 }
  0xfe   : > { %413 = vst [vmem:[#allocation2 + $0x8] sm:$0xff] %v407_v14  ;;  %v417_v18 = vadd.f32 %v415_v12, %v407_v14  ;;  %v423_v19 = vmul.f32 %v407_v14, %v407_v14 }
  0xff   : > { %418 = vst [vmem:[#allocation3] sm:$0xff] %v416_v15  ;;  %v424_v20 = vadd.f32 %v422_v16, %v420_v13 }
 0x100   : > { %419 = vst [vmem:[#allocation3 + $0x8] sm:$0xff] %v417_v18  ;;  %v425_v21 = vadd.f32 %v423_v19, %v421_v17 }
 0x101   : > { %426 = vst [vmem:[#allocation4] sm:$0xff] %v424_v20 }
 0x102   : > { %427 = vst [vmem:[#allocation4 + $0x8] sm:$0xff] %v425_v21 }
 0x103 PF: > { %p428_p1 = scmp.eq.s32.totalorder %s798_s26, 1 }
 0x104   : > { %v466_v50 = vld [vmem:[%s1013_s3] sm:$0xff] (%p428_p1)  ;;  %vm468_vm2 = vcmask (%p428_p1), 7168  }
 0x105   : > { %432 = sbr.rel (!%p428_p1) target bundleno = 501 (0x1f5), region = 56  ;;  %v470_v53 = vld [vmem:[%s1014_s4] sm:$0xff] (%p428_p1) }
 0x106   : > { %v433_v22 = vld [vmem:[#allocation3] sm:$0xff] (%p428_p1) }
 0x107   : > { %v434_v23 = vld [vmem:[#allocation3 + $0x8] sm:$0xff] (%p428_p1) }
 0x108   : > { %v446_v24 = vld [vmem:[#allocation4] sm:$0xff] (%p428_p1)  ;;  %v435_v25 = vadd.f32 (%p428_p1), %v434_v23, %v433_v22 }
 0x109   : > { %v447_v26 = vld [vmem:[#allocation4 + $0x8] sm:$0xff] (%p428_p1) }
 0x10a   : > { %436 = vadd.xlane.f32.xlu0 (%p428_p1), %v435_v25  ;;  %v448_v27 = vadd.f32 (%p428_p1), %v447_v26, %v446_v24 }
 0x10e   : > { %449 = vadd.xlane.f32.xlu0 %v448_v27 }
 0x197   : > { %v437_v28 = vpop.xlane.xlu0 %436 }
 0x198   : > { %v438_v29 = vrot.slane %v437_v28, 4 }
 0x19a   : > { %v439_v30 = vadd.f32 %v438_v29, %v437_v28 }
 0x19b   : > { %v450_v31 = vpop.xlane.xlu0 %449 }
 0x19c   : > { %v440_v32 = vrot.slane %v439_v30, 2  ;;  %v451_v33 = vrot.slane %v450_v31, 4 }
 0x19e   : > { %v452_v34 = vadd.f32 %v451_v33, %v450_v31  ;;  %v441_v35 = vadd.f32 %v440_v32, %v439_v30 }
 0x1a0   : > { %v453_v36 = vrot.slane %v452_v34, 2  ;;  %v442_v37 = vrot.slane %v441_v35, 1 }
 0x1a2   : > { %v454_v38 = vadd.f32 %v453_v36, %v452_v34  ;;  %v443_v39 = vadd.f32 %v442_v37, %v441_v35 }
 0x1a4   : > { %636 = vpush %v443_v39  ;;  %v455_v40 = vrot.slane %v454_v38, 1 }
 0x1a6   : > { %v456_v41 = vadd.f32 %v455_v40, %v454_v38 }
 0x1a8   : > { %638 = vpush %v456_v41 }
 0x1d5   : > { %s637_s16 = spop %636 }
 0x1d6   : > { %v445_v42 = vstv %s637_s16 }
 0x1d7   : > { %v459_v43 = vmul.f32 0.00048828125, %v445_v42 }
 0x1d9   : > { %s639_s17 = spop %638  ;;  %v461_v45 = vmul.f32 %v459_v43, %v459_v43 }
 0x1da   : > { %v458_v44 = vstv %s639_s17 }
 0x1db   : > { %v460_v46 = vmul.f32 0.00048828125, %v458_v44 }
 0x1dd   : > { %v462_v47 = vsub.f32 %v460_v46, %v461_v45 }
 0x1df   : > { %v463_v48 = vmax.f32 %v462_v47, 0.0 }
 0x1e1   : > { %v464_v49 = vadd.f32 1e-08, %v463_v48 }
 0x1e3   : > { %717 = vrsqrt.f32 %v464_v49 }
 0x1ed   : > { %v718_v51 = vpop.eup %717 }
 0x1ee   : > { %v467_v52 = vmul.f32 %v718_v51, %v466_v50 }
 0x1f0   : > { %469 = vst.msk [vmem:[#allocation5] sm:$0xff] %vm468_vm2, %v467_v52  ;;  %v471_v54 = vmul.f32 %v467_v52, %v459_v43 }
 0x1f2   : > { %v472_v55 = vsub.f32 %v470_v53, %v471_v54 }
 0x1f4   : > { %473 = vst.msk [vmem:[#allocation6] sm:$0xff] %vm468_vm2, %v472_v55 }
 0x1f5 PF: > { %p626_p2 = scmp.ne.s32.totalorder %s798_s26, 1 }
 0x1f6   : > { %v819_v57 = vmov (!%p626_p2), 0   ;;  %s498_s5 = sld [smem:[#allocation7]] (!%p626_p2)  ;;  %v480_v60 = vld [vmem:[#allocation2] sm:$0xff] (!%p626_p2)  ;;  %v481_v61 = vld [vmem:[#allocation2 + $0x8] sm:$0xff] (!%p626_p2) }
 0x1f7   : > { %476 = sbr.rel (%p626_p2) target bundleno = 642 (0x282), region = 60  ;;  %v482_v56 = vld [vmem:[#allocation5] sm:$0xff] (!%p626_p2)  ;;  %719 = vset.pattern.permute.xlu0 (!%p626_p2), %v819_v57 }
 0x1f8   : > { %485 = vperm.xlu0 (!%p626_p2), %719, %v482_v56  }
 0x1fb   : > { %v490_v58 = vld [vmem:[#allocation6] sm:$0xff] (!%p626_p2) }
 0x1fc   : > { %493 = vperm.xlu0 (!%p626_p2), %719, %v490_v58   ;;  %v501_v0 = vstv (!%p626_p2), %s498_s5 }
 0x277   : > { %v486_v59 = vpop.permute.xlu0 %485 }
 0x278   : > { %v488_v62 = vmul.f32 %v486_v59, %v480_v60  ;;  %v489_v63 = vmul.f32 %v486_v59, %v481_v61 }
 0x27b   : > { %v494_v1 = vpop.permute.xlu0 %493 }
 0x27c   : > { %v496_v2 = vadd.f32 %v494_v1, %v488_v62  ;;  %v497_v3 = vadd.f32 %v494_v1, %v489_v63 }
 0x27e   : > { %vm499_vm3 = vcmp.ge.f32.partialorder %v496_v2, 0.0  ;;  %vm500_vm4 = vcmp.ge.f32.partialorder %v497_v3, 0.0  ;;  %v502_v4 = vmul.f32 %v501_v0, %v496_v2  ;;  %v503_v5 = vmul.f32 %v501_v0, %v497_v3 }
 0x280   : > { %v504_v6 = vsel %vm499_vm3, %v496_v2, %v502_v4  ;;  %v505_v7 = vsel %vm500_vm4, %v497_v3, %v503_v5 }
 0x281   : > { %506 = vst [vmem:[%s937_s22] sm:$0xff] %v504_v6  ;;  %507 = vst [vmem:[%s937_s22 + $0x8] sm:$0xff] %v505_v7 }
 0x282 PF: > { %s635_s26 = sshll.u32 %s802_s27, 8  ;;  %s526_s16 = sshll.u32 %s937_s22, 4  ;;  %s527_s16 = int_to_ptr.vmem [resolvable:$true] %s526_s16 }
 0x283   : > { %s960_s13 = scalar_lea.hbm %s1016_s6, %s635_s26  ;;  %s509_s17 = scalar_lea.sflag [#allocation9], %s287_s15 }
 0x284   : > { %s720_s18 = scalar_lea.vmem %s527_s16, 256  ;;  %s820_s19 = smov [#allocation8]  }
 0x285   : > { %p721_p4 = scmp.ne.s32.totalorder %s527_s16, %s720_s18  ;;  %s724_s20 = sshll.u32 %s820_s19, 4  ;;  %s725_s20 = int_to_ptr.vmem [resolvable:$false] %s724_s20 }
 0x286   : > { %s726_s21 = scalar_lea.vmem %s725_s20, 512  ;;  %p727_p7 = scmp.lt.s32.totalorder %s527_s16, %s725_s20 }
 0x287   : > { %p722_p5 = pnand %p721_p4, %p908_p3  ;;  %p728_p8 = scmp.lt.s32.totalorder %s726_s21, %s720_s18 }
 0x289   : > { %p723_p6 = pneg %p722_p5  ;;  %p729_p10 = por %p728_p8, %p727_p7 }
 0x28b   : > { %p730_p11 = pnand %p729_p10, %p723_p6 }
 0x28d   : > { %733 = shalt.err (!%p730_p11)
}
 0x28e   : > { %s734_s27 = scalar_lea.hbm %s960_s13, 256  ;;  %s738_s5 = scalar_lea.hbm %s1016_s6, 512 }
 0x28f   : > { %p735_p12 = scmp.ne.s32.totalorder %s960_s13, %s734_s27  ;;  %p739_p1 = scmp.lt.u32.totalorder %s960_s13, %s1016_s6 }
 0x290   : > { %p740_p2 = scmp.lt.u32.totalorder %s738_s5, %s734_s27  ;;  %p742_p5 = scmp.lt.u32.totalorder %s734_s27, %s960_s13 }
 0x291   : > { %p736_p13 = pnand %p735_p12, %p908_p3 }
 0x292   : > { %p741_p4 = por %p740_p2, %p739_p1 }
 0x293   : > { %p737_p0 = pneg %p736_p13 }
 0x294   : > { %p743_p6 = por %p742_p5, %p741_p4 }
 0x296   : > { %p744_p7 = pnand %p743_p6, %p737_p0 }
 0x298   : > { %747 = shalt.err (!%p744_p7)
}
 0x299   : > { %640 = dma.vmem_to_hbm [thread:$0]  (%p908_p3), %s527_s16, 256, %s960_s13, %s509_s17  }
 0x29a PF: > { %p646_p8 = scmp.ge.s32.totalorder %s814_s30, 2  ;;  %s538_s12 = sand.u32 1, %s786_s23  }
 0x29b   : > { %s539_s18 = scalar_lea.sflag [#allocation9], %s538_s12 }
 0x29c   : > { %p643_p10 = pnand %p646_p8, %p918_p9 }
 0x29e   : > { %781 = dma.done.wait (!%p643_p10), %s539_s18, 256  }
 0x29f   : > { %783 = vsyncadd (!%p643_p10), %s539_s18, 4294967040  ;;  %s20_s30 = sadd.s32 1, %s814_s30   ;;  %s1019_s23 = smov %s790_s24 }
 0x2a0   : > { %p17_p11 = scmp.ge.s32.totalorder %s20_s30, 6   ;;  %s1020_s24 = smov %s794_s25 }
 0x2a1   : > { %s1021_s25 = smov %s926_s14  ;;  %s1022_s26 = smov %s806_s28 }
 0x2a2   : > { %s1023_s27 = smov %s810_s29  ;;  %s1024_s28 = smov %s1027_s8 }
 0x2a3   : > { %s1025_s29 = smov %s1031_s9  ;;  %19 = sbr.rel (!%p17_p11) target bundleno = 7 (0x7), region = 97 }
 0x2aa   :  { %544 = vsyncpa [#allocation9], 1 }
 0x2ab   :  { %546 = vsyncpa [#allocation9 + $0x1], 1 }

</bundles_post_ra>
